<compile_context>
chip_gen: v7x
topology: tpu7x:2x2x1
jax: 0.10.0
libtpu: 0.0.40
codegen_flags: <defaults>
</compile_context>

<pallas_src>
import jax
import jax.numpy as jnp
from jax import lax
from jax.experimental import pallas as pl
from jax.experimental.pallas import tpu as pltpu
import numpy as np


def arc_kernel(x_ref, w1h_ref, b1h_ref, w2h_ref, b2h_ref,
               w1d_ref, b1d_ref, w2d_ref, b2d_ref, u_ref,
               out_ref, rdsum_ref, v_ref):
    """Grid: (batch, pass, s_tile).  pass 0 = dep branch, pass 1 = head branch."""
    p = pl.program_id(1)
    t = pl.program_id(2)
    bf16 = jnp.bfloat16

    # ---------------- pass 0 (dep): accumulate key-sum of rd over S ----------------
    @pl.when(jnp.logical_and(p == 0, t == 0))
    def _init():
        rdsum_ref[...] = jnp.zeros_like(rdsum_ref)

    @pl.when(p == 0)
    def _dep_pass():
        h = jnp.dot(x_ref[...], w1d_ref[...], preferred_element_type=jnp.float32)
        h = jnp.maximum(h + b1d_ref[...], 0.0).astype(bf16)        # single bf16 cast
        rd = jnp.dot(h, w2d_ref[...], preferred_element_type=jnp.float32) + b2d_ref[...]
        rd = jnp.maximum(rd, 0.0)                                   # (tS, H/4) f32
        # sublane reduction on the XLU (free filler next to the MXU work)
        rdsum_ref[...] += jnp.sum(rd, axis=0, keepdims=True)

    # ---------------- pass 1 (head): finish the biaffine -------------------------
    @pl.when(jnp.logical_and(p == 1, t == 0))
    def _compute_v():
        # v[k, d] = sum_e U[k, d, e] * rd_sum[e]   (once per batch element)
        for k in range(2):
            v_ref[k:k + 1, :] = lax.dot_general(
                rdsum_ref[...], u_ref[k], (((1,), (1,)), ((), ())),
                preferred_element_type=jnp.float32)

    @pl.when(p == 1)
    def _head_pass():
        h = jnp.dot(x_ref[...], w1h_ref[...], preferred_element_type=jnp.float32)
        h = jnp.maximum(h + b1h_ref[...], 0.0).astype(bf16)
        rh = jnp.dot(h, w2h_ref[...], preferred_element_type=jnp.float32) + b2h_ref[...]
        rh = jnp.maximum(rh, 0.0)                                   # (tS, D) f32
        # out[s, k] = sum_d rh[s, d] * v[k, d]; rh stays un-transposed and the
        # (tS, 2) tile is stored directly in the PyTorch (B, S, 2) layout.
        out_ref[...] = lax.dot_general(
            rh, v_ref[...], (((1,), (1,)), ((), ())),
            preferred_element_type=jnp.float32)


def _pick_s_tile(S, H, H2, H4, D, weight_bytes, budget_bytes):
    """Largest S tile (divisor of S, multiple of 8) whose working set fits budget."""
    # bytes that scale with the tile: double-buffered bf16 x block, f32 out block,
    # and the per-pass intermediates (h f32, h bf16, r f32), with slack.
    per_row = 2 * H * 2 + 2 * 2 * 4 + H2 * 4 + H2 * 2 + max(D, H4) * 4
    per_row = int(per_row * 1.25) + 64
    avail = max(budget_bytes - weight_bytes, 8 * per_row)
    max_ts = max(avail // per_row, 8)
    if S <= max_ts:
        return S                                  # whole sequence in one tile
    best = 0
    for ts in range(8, int(min(S, max_ts)) + 1, 8):
        if S % ts == 0:
            best = ts
    return best if best > 0 else S                # no clean divisor: full-S fallback


def arc_module_forward(x, params, *, s_tile=None, vmem_budget_bytes=28 * 1024 * 1024):
    """x: (B, S, H) float32 -> (B, S, 2) float32 (ArcModule.forward, eval mode)."""
    (w1h, b1h, w2h, b2h, w1d, b1d, w2d, b2d, U) = params
    B, S, H = x.shape
    H2, H4 = H // 2, H // 4
    D = w2h.shape[1]

    # The PyTorch Biaffine(hidden/4, 2) only type-checks when output_dim == H/4.
    assert H % 4 == 0, "hidden size must be divisible by 4"
    assert D == H4 and U.shape == (2, H4, H4), (
        f"ArcModule requires output_dim == hidden/4 (D={D}, H/4={H4}, U={U.shape})")
    assert w1h.shape == (H, H2) and w1d.shape == (H, H2) and w2d.shape == (H2, H4)

    bf16 = jnp.bfloat16
    f32 = jnp.float32
    x_bf = x.astype(bf16)
    w1h_bf, w1d_bf = w1h.astype(bf16), w1d.astype(bf16)
    w2h_bf, w2d_bf = w2h.astype(bf16), w2d.astype(bf16)
    b1h_f, b1d_f = b1h.astype(f32), b1d.astype(f32)
    b2h_f, b2d_f = b2h.astype(f32), b2d.astype(f32)
    U_f = U.astype(f32)

    # conservative (double-buffered) weight footprint for budgeting
    weight_bytes = 2 * (w1h_bf.size + w1d_bf.size + w2h_bf.size + w2d_bf.size) * 2
    weight_bytes += 2 * U_f.size * 4
    weight_bytes += 2 * 4 * (b1h.size + b1d.size + b2h.size + b2d.size)

    tS = _pick_s_tile(S, H, H2, H4, D, weight_bytes, vmem_budget_bytes) \
        if s_tile is None else int(s_tile)
    assert S % tS == 0, f"S tile {tS} must divide S={S}"
    NT = S // tS

    per_row = 2 * H * 2 + 2 * 2 * 4 + H2 * 4 + H2 * 2 + max(D, H4) * 4
    est_bytes = weight_bytes + int(1.25 * per_row) * tS + (1 << 20)
    vmem_limit = int(min(max(2 * est_bytes, 24 * 1024 * 1024), 40 * 1024 * 1024))

    grid = (B, 2, NT)
    x_spec = pl.BlockSpec((None, tS, H), lambda b, p, t: (b, t, 0))
    out_spec = pl.BlockSpec((None, tS, 2), lambda b, p, t: (b, t, 0))

    def build(use_single_buffered_weights):
        def const_spec(shape):
            nd = len(shape)
            idx = lambda b, p, t, _nd=nd: (0,) * _nd
            if use_single_buffered_weights:
                # constant block index -> one resident copy is enough
                return pl.BlockSpec(shape, idx, pipeline_mode=pl.Buffered(1))
            return pl.BlockSpec(shape, idx)

        return pl.pallas_call(
            arc_kernel,
            out_shape=jax.ShapeDtypeStruct((B, S, 2), jnp.float32),
            grid=grid,
            in_specs=[
                x_spec,
                const_spec((H, H2)),      # W1h
                const_spec((1, H2)),      # b1h
                const_spec((H2, D)),      # W2h
                const_spec((1, D)),       # b2h
                const_spec((H, H2)),      # W1d
                const_spec((1, H2)),      # b1d
                const_spec((H2, H4)),     # W2d
                const_spec((1, H4)),      # b2d
                const_spec((2, H4, H4)),  # U (tiny after the key-sum rewrite)
            ],
            out_specs=out_spec,
            scratch_shapes=[
                pltpu.VMEM((1, H4), f32),   # rd_sum accumulator (per batch element)
                pltpu.VMEM((2, H4), f32),   # v = U @ rd_sum      (per batch element)
            ],
            compiler_params=pltpu.CompilerParams(
                # batch axis parallel for v7x megacore; pass/tile must stay serial
                dimension_semantics=("parallel", "arbitrary", "arbitrary"),
                vmem_limit_bytes=vmem_limit),
        )

    args = (x_bf, w1h_bf, b1h_f, w2h_bf, b2h_f, w1d_bf, b1d_f, w2d_bf, b2d_f, U_f)
    try:
        return build(True)(*args)
    except Exception:
        # pipeline_mode / pl.Buffered not supported in this jax build -> default specs
        return build(False)(*args)


def init_params(key, hidden, output_dim):
    """Deterministic synthetic parameters with the shapes ArcModule.__init__ implies."""
    H, H2, H4, D = hidden, hidden // 2, hidden // 4, output_dim
    ks = jax.random.split(key, 5)

    def lin(k, fan_in, fan_out):
        # PyTorch default Linear init: U(-1/sqrt(fan_in), 1/sqrt(fan_in))
        bound = 1.0 / np.sqrt(fan_in)
        kw, kb = jax.random.split(k)
        w = jax.random.uniform(kw, (fan_in, fan_out), jnp.float32, -bound, bound)
        b = jax.random.uniform(kb, (1, fan_out), jnp.float32, -bound, bound)
        return w, b

    w1h, b1h = lin(ks[0], H, H2)
    w2h, b2h = lin(ks[1], H2, D)
    w1d, b1d = lin(ks[2], H, H2)
    w2d, b2d = lin(ks[3], H2, H4)
    gain = np.sqrt(6.0 / (H4 + H4))                      # Xavier-uniform for Biaffine U
    U = jax.random.uniform(ks[4], (2, H4, H4), jnp.float32, -gain, gain)
    return (w1h, b1h, w2h, b2h, w1d, b1d, w2d, b2d, U)


def reference_forward(x, params):
    """Pure-f32 reference reproducing the PyTorch forward (eval mode)."""
    (w1h, b1h, w2h, b2h, w1d, b1d, w2d, b2d, U) = params
    hp = jax.lax.Precision.HIGHEST
    mm = lambda a, b: jnp.einsum('bsi,ij->bsj', a, b, precision=hp)
    rh = jax.nn.relu(mm(jax.nn.relu(mm(x, w1h) + b1h), w2h) + b2h)
    rd = jax.nn.relu(mm(jax.nn.relu(mm(x, w1d) + b1d), w2d) + b2d)
    s = jnp.einsum('bsd,kde,bte->bkst', rh, U, rd, precision=hp)    # (B, 2, S, S)
    return jnp.transpose(jnp.sum(s, axis=-1), (0, 2, 1))            # (B, S, 2)


def kernel_matched_reference(x, params):
    """Reference mirroring the kernel's bf16 roundings (x, matmul weights, and the
    first-layer activations); everything else in exact f32 with the PyTorch math
    order (einsum over the full (S, S) scores, then key-sum)."""
    (w1h, b1h, w2h, b2h, w1d, b1d, w2d, b2d, U) = params
    rnd = lambda a: a.astype(jnp.bfloat16).astype(jnp.float32)
    hp = jax.lax.Precision.HIGHEST
    mm = lambda a, b: jnp.einsum('bsi,ij->bsj', a, b, precision=hp)
    xq = rnd(x)
    h_h = rnd(jax.nn.relu(mm(xq, rnd(w1h)) + b1h))
    h_d = rnd(jax.nn.relu(mm(xq, rnd(w1d)) + b1d))
    rh = jax.nn.relu(mm(h_h, rnd(w2h)) + b2h)
    rd = jax.nn.relu(mm(h_d, rnd(w2d)) + b2d)
    s = jnp.einsum('bsd,kde,bte->bkst', rh, U, rd, precision=hp)
    return jnp.transpose(jnp.sum(s, axis=-1), (0, 2, 1))


if __name__ == "__main__":
    B, S, H = 2, 8, 32
    output_dim = H // 4          # Biaffine requires output_dim == hidden/4

    key = jax.random.PRNGKey(0)
    kx, kp, kx2 = jax.random.split(key, 3)
    x = jax.random.normal(kx, (B, S, H), jnp.float32)
    params = init_params(kp, H, output_dim)

    # 1) small shape: whole sequence in one S tile (grid = (B, 2, 1))
    out = jax.block_until_ready(arc_module_forward(x, params))
    assert out.shape == (B, S, 2)
    ref = kernel_matched_reference(x, params)
    # NOTE: the commuted key-sum changes the f32 summation order vs. the einsum
    # reference; at these sizes the tolerance is dominated by MXU f32 matmul
    # rounding, not the reordering.
    np.testing.assert_allclose(np.asarray(out), np.asarray(ref), rtol=2e-2, atol=2e-2)

    # 2) longer sequence with a forced small S tile to exercise the two-pass,
    #    S-tiled accumulation path (grid = (B, 2, S/tS) = (2, 2, 4)).
    S2 = 64
    x2 = jax.random.normal(kx2, (B, S2, H), jnp.float32)
    out2 = jax.block_until_ready(arc_module_forward(x2, params, s_tile=16))
    assert out2.shape == (B, S2, 2)
    ref2 = kernel_matched_reference(x2, params)
    np.testing.assert_allclose(np.asarray(out2), np.asarray(ref2), rtol=2e-2, atol=2e-2)

    print("KERNEL_OK")
</pallas_src>

<mosaic_0001>
module attributes {stable_mosaic.version = 11 : i64} {
  func.func @arc_kernel(%arg0: i32, %arg1: i32, %arg2: i32, %arg3: memref<1x8x32xbf16, #tpu.memory_space<vmem>>, %arg4: memref<32x16xbf16, #tpu.memory_space<vmem>>, %arg5: memref<1x16xf32, #tpu.memory_space<vmem>>, %arg6: memref<16x8xbf16, #tpu.memory_space<vmem>>, %arg7: memref<1x8xf32, #tpu.memory_space<vmem>>, %arg8: memref<32x16xbf16, #tpu.memory_space<vmem>>, %arg9: memref<1x16xf32, #tpu.memory_space<vmem>>, %arg10: memref<16x8xbf16, #tpu.memory_space<vmem>>, %arg11: memref<1x8xf32, #tpu.memory_space<vmem>>, %arg12: memref<2x8x8xf32, #tpu.memory_space<vmem>>, %arg13: memref<1x8x2xf32, #tpu.memory_space<vmem>>, %arg14: memref<1x8xf32, #tpu.memory_space<vmem>>, %arg15: memref<2x8xf32, #tpu.memory_space<vmem>>) attributes {dimension_semantics = [#tpu.dimension_semantics<parallel>, #tpu.dimension_semantics<arbitrary>, #tpu.dimension_semantics<arbitrary>], iteration_bounds = array<i64: 2, 2, 1>, scalar_prefetch = 0 : i64, scratch_operands = 2 : i64, tpu.core_type = #tpu.core_type<tc>, window_params = [{transform_indices = @transform_0, window_bounds = array<i64: 1, 8, 32>}, {pipeline_mode = #tpu.pipeline_mode<synchronous>, transform_indices = @transform_1, window_bounds = array<i64: 32, 16>}, {pipeline_mode = #tpu.pipeline_mode<synchronous>, transform_indices = @transform_2, window_bounds = array<i64: 1, 16>}, {pipeline_mode = #tpu.pipeline_mode<synchronous>, transform_indices = @transform_3, window_bounds = array<i64: 16, 8>}, {pipeline_mode = #tpu.pipeline_mode<synchronous>, transform_indices = @transform_4, window_bounds = array<i64: 1, 8>}, {pipeline_mode = #tpu.pipeline_mode<synchronous>, transform_indices = @transform_5, window_bounds = array<i64: 32, 16>}, {pipeline_mode = #tpu.pipeline_mode<synchronous>, transform_indices = @transform_6, window_bounds = array<i64: 1, 16>}, {pipeline_mode = #tpu.pipeline_mode<synchronous>, transform_indices = @transform_7, window_bounds = array<i64: 16, 8>}, {pipeline_mode = #tpu.pipeline_mode<synchronous>, transform_indices = @transform_8, window_bounds = array<i64: 1, 8>}, {pipeline_mode = #tpu.pipeline_mode<synchronous>, transform_indices = @transform_9, window_bounds = array<i64: 2, 8, 8>}, {transform_indices = @transform_10, window_bounds = array<i64: 1, 8, 2>}]} {
    %c0_i32 = arith.constant 0 : i32
    %0 = arith.cmpi eq, %arg1, %c0_i32 : i32
    %c0_i32_0 = arith.constant 0 : i32
    %1 = arith.cmpi eq, %arg2, %c0_i32_0 : i32
    %2 = arith.andi %0, %1 : i1
    %3 = arith.extui %2 : i1 to i32
    %c0_i32_1 = arith.constant 0 : i32
    %4 = arith.cmpi ne, %3, %c0_i32_1 : i32
    scf.if %4 {
      %cst = arith.constant 0.000000e+00 : f32
      %16 = vector.broadcast %cst : f32 to vector<1x8xf32>
      %c0 = arith.constant 0 : index
      %c0_8 = arith.constant 0 : index
      %17 = vector.load %arg14[%c0, %c0_8] : memref<1x8xf32, #tpu.memory_space<vmem>>, vector<1x8xf32>
      tpu.vector_store %arg14[%c0, %c0_8], %16 {strides = array<i32>} : memref<1x8xf32, #tpu.memory_space<vmem>>, vector<1x8xf32>,
    } else {
    }
    %c0_i32_2 = arith.constant 0 : i32
    %5 = arith.cmpi eq, %arg1, %c0_i32_2 : i32
    %6 = arith.extui %5 : i1 to i32
    %c0_i32_3 = arith.constant 0 : i32
    %7 = arith.cmpi ne, %6, %c0_i32_3 : i32
    scf.if %7 {
      %c0 = arith.constant 0 : index
      %c0_8 = arith.constant 0 : index
      %c0_9 = arith.constant 0 : index
      %16 = vector.load %arg3[%c0, %c0_8, %c0_9] : memref<1x8x32xbf16, #tpu.memory_space<vmem>>, vector<1x8x32xbf16>
      %17 = vector.shape_cast %16 : vector<1x8x32xbf16> to vector<8x32xbf16>
      %c0_10 = arith.constant 0 : index
      %c0_11 = arith.constant 0 : index
      %18 = vector.load %arg8[%c0_10, %c0_11] : memref<32x16xbf16, #tpu.memory_space<vmem>>, vector<32x16xbf16>
      %cst = arith.constant dense<0.000000e+00> : vector<8x16xf32>
      %19 = tpu.matmul %17, %18, %cst {dimension_numbers = #tpu.dot_dimension_numbers<[1], [0], [0], [1], [0, 0, 1, 1], [], []>} : vector<8x32xbf16>, vector<32x16xbf16>, vector<8x16xf32> -> vector<8x16xf32>
      %c0_12 = arith.constant 0 : index
      %c0_13 = arith.constant 0 : index
      %20 = vector.load %arg9[%c0_12, %c0_13] : memref<1x16xf32, #tpu.memory_space<vmem>>, vector<1x16xf32>
      %21 = vector.broadcast %20 : vector<1x16xf32> to vector<8x16xf32>
      %22 = arith.addf %19, %21 : vector<8x16xf32>
      %cst_14 = arith.constant 0.000000e+00 : f32
      %23 = vector.broadcast %cst_14 : f32 to vector<8x16xf32>
      %24 = arith.maximumf %22, %23 : vector<8x16xf32>
      %25 = arith.truncf %24 : vector<8x16xf32> to vector<8x16xbf16>
      %c0_15 = arith.constant 0 : index
      %c0_16 = arith.constant 0 : index
      %26 = vector.load %arg10[%c0_15, %c0_16] : memref<16x8xbf16, #tpu.memory_space<vmem>>, vector<16x8xbf16>
      %cst_17 = arith.constant dense<0.000000e+00> : vector<8x8xf32>
      %27 = tpu.matmul %25, %26, %cst_17 {dimension_numbers = #tpu.dot_dimension_numbers<[1], [0], [0], [1], [0, 0, 1, 1], [], []>} : vector<8x16xbf16>, vector<16x8xbf16>, vector<8x8xf32> -> vector<8x8xf32>
      %c0_18 = arith.constant 0 : index
      %c0_19 = arith.constant 0 : index
      %28 = vector.load %arg11[%c0_18, %c0_19] : memref<1x8xf32, #tpu.memory_space<vmem>>, vector<1x8xf32>
      %29 = vector.broadcast %28 : vector<1x8xf32> to vector<8x8xf32>
      %30 = arith.addf %27, %29 : vector<8x8xf32>
      %cst_20 = arith.constant 0.000000e+00 : f32
      %31 = vector.broadcast %cst_20 : f32 to vector<8x8xf32>
      %32 = arith.maximumf %30, %31 : vector<8x8xf32>
      %c0_21 = arith.constant 0 : index
      %c0_22 = arith.constant 0 : index
      %33 = vector.load %arg14[%c0_21, %c0_22] : memref<1x8xf32, #tpu.memory_space<vmem>>, vector<1x8xf32>
      %cst_23 = arith.constant dense<0.000000e+00> : vector<8xf32>
      %34 = vector.multi_reduction <add>, %32, %cst_23 [0] : vector<8x8xf32> to vector<8xf32>
      %35 = vector.shape_cast %34 : vector<8xf32> to vector<1x8xf32>
      %36 = arith.addf %33, %35 : vector<1x8xf32>
      %c0_24 = arith.constant 0 : index
      %c0_25 = arith.constant 0 : index
      %37 = vector.load %arg14[%c0_24, %c0_25] : memref<1x8xf32, #tpu.memory_space<vmem>>, vector<1x8xf32>
      tpu.vector_store %arg14[%c0_24, %c0_25], %36 {strides = array<i32>} : memref<1x8xf32, #tpu.memory_space<vmem>>, vector<1x8xf32>,
    } else {
    }
    %c1_i32 = arith.constant 1 : i32
    %8 = arith.cmpi eq, %arg1, %c1_i32 : i32
    %c0_i32_4 = arith.constant 0 : i32
    %9 = arith.cmpi eq, %arg2, %c0_i32_4 : i32
    %10 = arith.andi %8, %9 : i1
    %11 = arith.extui %10 : i1 to i32
    %c0_i32_5 = arith.constant 0 : i32
    %12 = arith.cmpi ne, %11, %c0_i32_5 : i32
    scf.if %12 {
      %c0 = arith.constant 0 : index
      %c0_8 = arith.constant 0 : index
      %16 = vector.load %arg14[%c0, %c0_8] : memref<1x8xf32, #tpu.memory_space<vmem>>, vector<1x8xf32>
      %c0_9 = arith.constant 0 : index
      %c0_10 = arith.constant 0 : index
      %c0_11 = arith.constant 0 : index
      %17 = vector.load %arg12[%c0_9, %c0_10, %c0_11] : memref<2x8x8xf32, #tpu.memory_space<vmem>>, vector<1x8x8xf32>
      %18 = vector.shape_cast %17 : vector<1x8x8xf32> to vector<8x8xf32>
      %cst = arith.constant dense<0.000000e+00> : vector<1x8xf32>
      %19 = tpu.matmul %16, %18, %cst {dimension_numbers = #tpu.dot_dimension_numbers<[1], [1], [0], [0], [0, 0, 1, 0], [], []>} : vector<1x8xf32>, vector<8x8xf32>, vector<1x8xf32> -> vector<1x8xf32>
      %c0_12 = arith.constant 0 : index
      %c0_13 = arith.constant 0 : index
      %20 = vector.load %arg15[%c0_12, %c0_13] : memref<2x8xf32, #tpu.memory_space<vmem>>, vector<1x8xf32>
      tpu.vector_store %arg15[%c0_12, %c0_13], %19 {strides = array<i32>} : memref<2x8xf32, #tpu.memory_space<vmem>>, vector<1x8xf32>,
      %c0_14 = arith.constant 0 : index
      %c0_15 = arith.constant 0 : index
      %21 = vector.load %arg14[%c0_14, %c0_15] : memref<1x8xf32, #tpu.memory_space<vmem>>, vector<1x8xf32>
      %c1 = arith.constant 1 : index
      %c0_16 = arith.constant 0 : index
      %c0_17 = arith.constant 0 : index
      %22 = vector.load %arg12[%c1, %c0_16, %c0_17] : memref<2x8x8xf32, #tpu.memory_space<vmem>>, vector<1x8x8xf32>
      %23 = vector.shape_cast %22 : vector<1x8x8xf32> to vector<8x8xf32>
      %cst_18 = arith.constant dense<0.000000e+00> : vector<1x8xf32>
      %24 = tpu.matmul %21, %23, %cst_18 {dimension_numbers = #tpu.dot_dimension_numbers<[1], [1], [0], [0], [0, 0, 1, 0], [], []>} : vector<1x8xf32>, vector<8x8xf32>, vector<1x8xf32> -> vector<1x8xf32>
      %c1_19 = arith.constant 1 : index
      %c0_20 = arith.constant 0 : index
      %25 = vector.load %arg15[%c1_19, %c0_20] : memref<2x8xf32, #tpu.memory_space<vmem>>, vector<1x8xf32>
      tpu.vector_store %arg15[%c1_19, %c0_20], %24 {strides = array<i32>} : memref<2x8xf32, #tpu.memory_space<vmem>>, vector<1x8xf32>,
    } else {
    }
    %c1_i32_6 = arith.constant 1 : i32
    %13 = arith.cmpi eq, %arg1, %c1_i32_6 : i32
    %14 = arith.extui %13 : i1 to i32
    %c0_i32_7 = arith.constant 0 : i32
    %15 = arith.cmpi ne, %14, %c0_i32_7 : i32
    scf.if %15 {
      %c0 = arith.constant 0 : index
      %c0_8 = arith.constant 0 : index
      %c0_9 = arith.constant 0 : index
      %16 = vector.load %arg3[%c0, %c0_8, %c0_9] : memref<1x8x32xbf16, #tpu.memory_space<vmem>>, vector<1x8x32xbf16>
      %17 = vector.shape_cast %16 : vector<1x8x32xbf16> to vector<8x32xbf16>
      %c0_10 = arith.constant 0 : index
      %c0_11 = arith.constant 0 : index
      %18 = vector.load %arg4[%c0_10, %c0_11] : memref<32x16xbf16, #tpu.memory_space<vmem>>, vector<32x16xbf16>
      %cst = arith.constant dense<0.000000e+00> : vector<8x16xf32>
      %19 = tpu.matmul %17, %18, %cst {dimension_numbers = #tpu.dot_dimension_numbers<[1], [0], [0], [1], [0, 0, 1, 1], [], []>} : vector<8x32xbf16>, vector<32x16xbf16>, vector<8x16xf32> -> vector<8x16xf32>
      %c0_12 = arith.constant 0 : index
      %c0_13 = arith.constant 0 : index
      %20 = vector.load %arg5[%c0_12, %c0_13] : memref<1x16xf32, #tpu.memory_space<vmem>>, vector<1x16xf32>
      %21 = vector.broadcast %20 : vector<1x16xf32> to vector<8x16xf32>
      %22 = arith.addf %19, %21 : vector<8x16xf32>
      %cst_14 = arith.constant 0.000000e+00 : f32
      %23 = vector.broadcast %cst_14 : f32 to vector<8x16xf32>
      %24 = arith.maximumf %22, %23 : vector<8x16xf32>
      %25 = arith.truncf %24 : vector<8x16xf32> to vector<8x16xbf16>
      %c0_15 = arith.constant 0 : index
      %c0_16 = arith.constant 0 : index
      %26 = vector.load %arg6[%c0_15, %c0_16] : memref<16x8xbf16, #tpu.memory_space<vmem>>, vector<16x8xbf16>
      %cst_17 = arith.constant dense<0.000000e+00> : vector<8x8xf32>
      %27 = tpu.matmul %25, %26, %cst_17 {dimension_numbers = #tpu.dot_dimension_numbers<[1], [0], [0], [1], [0, 0, 1, 1], [], []>} : vector<8x16xbf16>, vector<16x8xbf16>, vector<8x8xf32> -> vector<8x8xf32>
      %c0_18 = arith.constant 0 : index
      %c0_19 = arith.constant 0 : index
      %28 = vector.load %arg7[%c0_18, %c0_19] : memref<1x8xf32, #tpu.memory_space<vmem>>, vector<1x8xf32>
      %29 = vector.broadcast %28 : vector<1x8xf32> to vector<8x8xf32>
      %30 = arith.addf %27, %29 : vector<8x8xf32>
      %cst_20 = arith.constant 0.000000e+00 : f32
      %31 = vector.broadcast %cst_20 : f32 to vector<8x8xf32>
      %32 = arith.maximumf %30, %31 : vector<8x8xf32>
      %c0_21 = arith.constant 0 : index
      %c0_22 = arith.constant 0 : index
      %33 = vector.load %arg15[%c0_21, %c0_22] : memref<2x8xf32, #tpu.memory_space<vmem>>, vector<2x8xf32>
      %cst_23 = arith.constant dense<0.000000e+00> : vector<8x2xf32>
      %34 = tpu.matmul %32, %33, %cst_23 {dimension_numbers = #tpu.dot_dimension_numbers<[1], [1], [0], [0], [0, 0, 1, 0], [], []>} : vector<8x8xf32>, vector<2x8xf32>, vector<8x2xf32> -> vector<8x2xf32>
      %c0_24 = arith.constant 0 : index
      %c0_25 = arith.constant 0 : index
      %c0_26 = arith.constant 0 : index
      %35 = vector.load %arg13[%c0_24, %c0_25, %c0_26] : memref<1x8x2xf32, #tpu.memory_space<vmem>>, vector<1x8x2xf32>
      %36 = vector.shape_cast %35 : vector<1x8x2xf32> to vector<8x2xf32>
      %37 = vector.shape_cast %34 : vector<8x2xf32> to vector<1x8x2xf32>
      tpu.vector_store %arg13[%c0_24, %c0_25, %c0_26], %37 {strides = array<i32>} : memref<1x8x2xf32, #tpu.memory_space<vmem>>, vector<1x8x2xf32>,
    } else {
    }
    return
  }
  func.func @transform_0(%arg0: i32, %arg1: i32, %arg2: i32) -> (i32, i32, i32) {
    %c0_i32 = arith.constant 0 : i32
    %c0_i32_0 = arith.constant 0 : i32
    return %arg0, %arg2, %c0_i32 : i32, i32, i32
  }
  func.func @transform_1(%arg0: i32, %arg1: i32, %arg2: i32) -> (i32, i32) {
    %c0_i32 = arith.constant 0 : i32
    %c0_i32_0 = arith.constant 0 : i32
    %c0_i32_1 = arith.constant 0 : i32
    return %c0_i32, %c0_i32_0 : i32, i32
  }
  func.func @transform_2(%arg0: i32, %arg1: i32, %arg2: i32) -> (i32, i32) {
    %c0_i32 = arith.constant 0 : i32
    %c0_i32_0 = arith.constant 0 : i32
    %c0_i32_1 = arith.constant 0 : i32
    return %c0_i32, %c0_i32_0 : i32, i32
  }
  func.func @transform_3(%arg0: i32, %arg1: i32, %arg2: i32) -> (i32, i32) {
    %c0_i32 = arith.constant 0 : i32
    %c0_i32_0 = arith.constant 0 : i32
    %c0_i32_1 = arith.constant 0 : i32
    return %c0_i32, %c0_i32_0 : i32, i32
  }
  func.func @transform_4(%arg0: i32, %arg1: i32, %arg2: i32) -> (i32, i32) {
    %c0_i32 = arith.constant 0 : i32
    %c0_i32_0 = arith.constant 0 : i32
    %c0_i32_1 = arith.constant 0 : i32
    return %c0_i32, %c0_i32_0 : i32, i32
  }
  func.func @transform_5(%arg0: i32, %arg1: i32, %arg2: i32) -> (i32, i32) {
    %c0_i32 = arith.constant 0 : i32
    %c0_i32_0 = arith.constant 0 : i32
    %c0_i32_1 = arith.constant 0 : i32
    return %c0_i32, %c0_i32_0 : i32, i32
  }
  func.func @transform_6(%arg0: i32, %arg1: i32, %arg2: i32) -> (i32, i32) {
    %c0_i32 = arith.constant 0 : i32
    %c0_i32_0 = arith.constant 0 : i32
    %c0_i32_1 = arith.constant 0 : i32
    return %c0_i32, %c0_i32_0 : i32, i32
  }
  func.func @transform_7(%arg0: i32, %arg1: i32, %arg2: i32) -> (i32, i32) {
    %c0_i32 = arith.constant 0 : i32
    %c0_i32_0 = arith.constant 0 : i32
    %c0_i32_1 = arith.constant 0 : i32
    return %c0_i32, %c0_i32_0 : i32, i32
  }
  func.func @transform_8(%arg0: i32, %arg1: i32, %arg2: i32) -> (i32, i32) {
    %c0_i32 = arith.constant 0 : i32
    %c0_i32_0 = arith.constant 0 : i32
    %c0_i32_1 = arith.constant 0 : i32
    return %c0_i32, %c0_i32_0 : i32, i32
  }
  func.func @transform_9(%arg0: i32, %arg1: i32, %arg2: i32) -> (i32, i32, i32) {
    %c0_i32 = arith.constant 0 : i32
    %c0_i32_0 = arith.constant 0 : i32
    %c0_i32_1 = arith.constant 0 : i32
    %c0_i32_2 = arith.constant 0 : i32
    return %c0_i32, %c0_i32_0, %c0_i32_1 : i32, i32, i32
  }
  func.func @transform_10(%arg0: i32, %arg1: i32, %arg2: i32) -> (i32, i32, i32) {
    %c0_i32 = arith.constant 0 : i32
    %c0_i32_0 = arith.constant 0 : i32
    return %arg0, %arg2, %c0_i32 : i32, i32, i32
  }
}

module attributes {stable_mosaic.version = 11 : i64} {
  func.func @arc_kernel(%arg0: i32, %arg1: i32, %arg2: i32, %arg3: memref<1x8x32xbf16, #tpu.memory_space<vmem>>, %arg4: memref<32x16xbf16, #tpu.memory_space<vmem>>, %arg5: memref<1x16xf32, #tpu.memory_space<vmem>>, %arg6: memref<16x8xbf16, #tpu.memory_space<vmem>>, %arg7: memref<1x8xf32, #tpu.memory_space<vmem>>, %arg8: memref<32x16xbf16, #tpu.memory_space<vmem>>, %arg9: memref<1x16xf32, #tpu.memory_space<vmem>>, %arg10: memref<16x8xbf16, #tpu.memory_space<vmem>>, %arg11: memref<1x8xf32, #tpu.memory_space<vmem>>, %arg12: memref<2x8x8xf32, #tpu.memory_space<vmem>>, %arg13: memref<1x8x2xf32, #tpu.memory_space<vmem>>, %arg14: memref<1x8xf32, #tpu.memory_space<vmem>>, %arg15: memref<2x8xf32, #tpu.memory_space<vmem>>) attributes {dimension_semantics = [#tpu.dimension_semantics<parallel>, #tpu.dimension_semantics<arbitrary>, #tpu.dimension_semantics<arbitrary>], iteration_bounds = array<i64: 2, 2, 1>, scalar_prefetch = 0 : i64, scratch_operands = 2 : i64, tpu.core_type = #tpu.core_type<tc>, window_params = [{transform_indices = @transform_0, window_bounds = array<i64: 1, 8, 32>}, {pipeline_mode = #tpu.pipeline_mode<synchronous>, transform_indices = @transform_1, window_bounds = array<i64: 32, 16>}, {pipeline_mode = #tpu.pipeline_mode<synchronous>, transform_indices = @transform_2, window_bounds = array<i64: 1, 16>}, {pipeline_mode = #tpu.pipeline_mode<synchronous>, transform_indices = @transform_3, window_bounds = array<i64: 16, 8>}, {pipeline_mode = #tpu.pipeline_mode<synchronous>, transform_indices = @transform_4, window_bounds = array<i64: 1, 8>}, {pipeline_mode = #tpu.pipeline_mode<synchronous>, transform_indices = @transform_5, window_bounds = array<i64: 32, 16>}, {pipeline_mode = #tpu.pipeline_mode<synchronous>, transform_indices = @transform_6, window_bounds = array<i64: 1, 16>}, {pipeline_mode = #tpu.pipeline_mode<synchronous>, transform_indices = @transform_7, window_bounds = array<i64: 16, 8>}, {pipeline_mode = #tpu.pipeline_mode<synchronous>, transform_indices = @transform_8, window_bounds = array<i64: 1, 8>}, {pipeline_mode = #tpu.pipeline_mode<synchronous>, transform_indices = @transform_9, window_bounds = array<i64: 2, 8, 8>}, {transform_indices = @transform_10, window_bounds = array<i64: 1, 8, 2>}]} {
    %c0_i32 = arith.constant 0 : i32
    %0 = arith.cmpi eq, %arg1, %c0_i32 : i32
    %c0_i32_0 = arith.constant 0 : i32
    %1 = arith.cmpi eq, %arg2, %c0_i32_0 : i32
    %2 = arith.andi %0, %1 : i1
    %3 = arith.extui %2 : i1 to i32
    %c0_i32_1 = arith.constant 0 : i32
    %4 = arith.cmpi ne, %3, %c0_i32_1 : i32
    scf.if %4 {
      %cst = arith.constant 0.000000e+00 : f32
      %16 = vector.broadcast %cst : f32 to vector<1x8xf32>
      %c0 = arith.constant 0 : index
      %c0_8 = arith.constant 0 : index
      %17 = vector.load %arg14[%c0, %c0_8] : memref<1x8xf32, #tpu.memory_space<vmem>>, vector<1x8xf32>
      tpu.vector_store %arg14[%c0, %c0_8], %16 {strides = array<i32>} : memref<1x8xf32, #tpu.memory_space<vmem>>, vector<1x8xf32>,
    } else {
    }
    %c0_i32_2 = arith.constant 0 : i32
    %5 = arith.cmpi eq, %arg1, %c0_i32_2 : i32
    %6 = arith.extui %5 : i1 to i32
    %c0_i32_3 = arith.constant 0 : i32
    %7 = arith.cmpi ne, %6, %c0_i32_3 : i32
    scf.if %7 {
      %c0 = arith.constant 0 : index
      %c0_8 = arith.constant 0 : index
      %c0_9 = arith.constant 0 : index
      %16 = vector.load %arg3[%c0, %c0_8, %c0_9] : memref<1x8x32xbf16, #tpu.memory_space<vmem>>, vector<1x8x32xbf16>
      %17 = vector.shape_cast %16 : vector<1x8x32xbf16> to vector<8x32xbf16>
      %c0_10 = arith.constant 0 : index
      %c0_11 = arith.constant 0 : index
      %18 = vector.load %arg8[%c0_10, %c0_11] : memref<32x16xbf16, #tpu.memory_space<vmem>>, vector<32x16xbf16>
      %cst = arith.constant dense<0.000000e+00> : vector<8x16xf32>
      %19 = tpu.matmul %17, %18, %cst {dimension_numbers = #tpu.dot_dimension_numbers<[1], [0], [0], [1], [0, 0, 1, 1], [], []>} : vector<8x32xbf16>, vector<32x16xbf16>, vector<8x16xf32> -> vector<8x16xf32>
      %c0_12 = arith.constant 0 : index
      %c0_13 = arith.constant 0 : index
      %20 = vector.load %arg9[%c0_12, %c0_13] : memref<1x16xf32, #tpu.memory_space<vmem>>, vector<1x16xf32>
      %21 = vector.broadcast %20 : vector<1x16xf32> to vector<8x16xf32>
      %22 = arith.addf %19, %21 : vector<8x16xf32>
      %cst_14 = arith.constant 0.000000e+00 : f32
      %23 = vector.broadcast %cst_14 : f32 to vector<8x16xf32>
      %24 = arith.maximumf %22, %23 : vector<8x16xf32>
      %25 = arith.truncf %24 : vector<8x16xf32> to vector<8x16xbf16>
      %c0_15 = arith.constant 0 : index
      %c0_16 = arith.constant 0 : index
      %26 = vector.load %arg10[%c0_15, %c0_16] : memref<16x8xbf16, #tpu.memory_space<vmem>>, vector<16x8xbf16>
      %cst_17 = arith.constant dense<0.000000e+00> : vector<8x8xf32>
      %27 = tpu.matmul %25, %26, %cst_17 {dimension_numbers = #tpu.dot_dimension_numbers<[1], [0], [0], [1], [0, 0, 1, 1], [], []>} : vector<8x16xbf16>, vector<16x8xbf16>, vector<8x8xf32> -> vector<8x8xf32>
      %c0_18 = arith.constant 0 : index
      %c0_19 = arith.constant 0 : index
      %28 = vector.load %arg11[%c0_18, %c0_19] : memref<1x8xf32, #tpu.memory_space<vmem>>, vector<1x8xf32>
      %29 = vector.broadcast %28 : vector<1x8xf32> to vector<8x8xf32>
      %30 = arith.addf %27, %29 : vector<8x8xf32>
      %cst_20 = arith.constant 0.000000e+00 : f32
      %31 = vector.broadcast %cst_20 : f32 to vector<8x8xf32>
      %32 = arith.maximumf %30, %31 : vector<8x8xf32>
      %c0_21 = arith.constant 0 : index
      %c0_22 = arith.constant 0 : index
      %33 = vector.load %arg14[%c0_21, %c0_22] : memref<1x8xf32, #tpu.memory_space<vmem>>, vector<1x8xf32>
      %cst_23 = arith.constant dense<0.000000e+00> : vector<8xf32>
      %34 = vector.multi_reduction <add>, %32, %cst_23 [0] : vector<8x8xf32> to vector<8xf32>
      %35 = vector.shape_cast %34 : vector<8xf32> to vector<1x8xf32>
      %36 = arith.addf %33, %35 : vector<1x8xf32>
      %c0_24 = arith.constant 0 : index
      %c0_25 = arith.constant 0 : index
      %37 = vector.load %arg14[%c0_24, %c0_25] : memref<1x8xf32, #tpu.memory_space<vmem>>, vector<1x8xf32>
      tpu.vector_store %arg14[%c0_24, %c0_25], %36 {strides = array<i32>} : memref<1x8xf32, #tpu.memory_space<vmem>>, vector<1x8xf32>,
    } else {
    }
    %c1_i32 = arith.constant 1 : i32
    %8 = arith.cmpi eq, %arg1, %c1_i32 : i32
    %c0_i32_4 = arith.constant 0 : i32
    %9 = arith.cmpi eq, %arg2, %c0_i32_4 : i32
    %10 = arith.andi %8, %9 : i1
    %11 = arith.extui %10 : i1 to i32
    %c0_i32_5 = arith.constant 0 : i32
    %12 = arith.cmpi ne, %11, %c0_i32_5 : i32
    scf.if %12 {
      %c0 = arith.constant 0 : index
      %c0_8 = arith.constant 0 : index
      %16 = vector.load %arg14[%c0, %c0_8] : memref<1x8xf32, #tpu.memory_space<vmem>>, vector<1x8xf32>
      %c0_9 = arith.constant 0 : index
      %c0_10 = arith.constant 0 : index
      %c0_11 = arith.constant 0 : index
      %17 = vector.load %arg12[%c0_9, %c0_10, %c0_11] : memref<2x8x8xf32, #tpu.memory_space<vmem>>, vector<1x8x8xf32>
      %18 = vector.shape_cast %17 : vector<1x8x8xf32> to vector<8x8xf32>
      %cst = arith.constant dense<0.000000e+00> : vector<1x8xf32>
      %19 = tpu.matmul %16, %18, %cst {dimension_numbers = #tpu.dot_dimension_numbers<[1], [1], [0], [0], [0, 0, 1, 0], [], []>} : vector<1x8xf32>, vector<8x8xf32>, vector<1x8xf32> -> vector<1x8xf32>
      %c0_12 = arith.constant 0 : index
      %c0_13 = arith.constant 0 : index
      %20 = vector.load %arg15[%c0_12, %c0_13] : memref<2x8xf32, #tpu.memory_space<vmem>>, vector<1x8xf32>
      tpu.vector_store %arg15[%c0_12, %c0_13], %19 {strides = array<i32>} : memref<2x8xf32, #tpu.memory_space<vmem>>, vector<1x8xf32>,
      %c0_14 = arith.constant 0 : index
      %c0_15 = arith.constant 0 : index
      %21 = vector.load %arg14[%c0_14, %c0_15] : memref<1x8xf32, #tpu.memory_space<vmem>>, vector<1x8xf32>
      %c1 = arith.constant 1 : index
      %c0_16 = arith.constant 0 : index
      %c0_17 = arith.constant 0 : index
      %22 = vector.load %arg12[%c1, %c0_16, %c0_17] : memref<2x8x8xf32, #tpu.memory_space<vmem>>, vector<1x8x8xf32>
      %23 = vector.shape_cast %22 : vector<1x8x8xf32> to vector<8x8xf32>
      %cst_18 = arith.constant dense<0.000000e+00> : vector<1x8xf32>
      %24 = tpu.matmul %21, %23, %cst_18 {dimension_numbers = #tpu.dot_dimension_numbers<[1], [1], [0], [0], [0, 0, 1, 0], [], []>} : vector<1x8xf32>, vector<8x8xf32>, vector<1x8xf32> -> vector<1x8xf32>
      %c1_19 = arith.constant 1 : index
      %c0_20 = arith.constant 0 : index
      %25 = vector.load %arg15[%c1_19, %c0_20] : memref<2x8xf32, #tpu.memory_space<vmem>>, vector<1x8xf32>
      tpu.vector_store %arg15[%c1_19, %c0_20], %24 {strides = array<i32>} : memref<2x8xf32, #tpu.memory_space<vmem>>, vector<1x8xf32>,
    } else {
    }
    %c1_i32_6 = arith.constant 1 : i32
    %13 = arith.cmpi eq, %arg1, %c1_i32_6 : i32
    %14 = arith.extui %13 : i1 to i32
    %c0_i32_7 = arith.constant 0 : i32
    %15 = arith.cmpi ne, %14, %c0_i32_7 : i32
    scf.if %15 {
      %c0 = arith.constant 0 : index
      %c0_8 = arith.constant 0 : index
      %c0_9 = arith.constant 0 : index
      %16 = vector.load %arg3[%c0, %c0_8, %c0_9] : memref<1x8x32xbf16, #tpu.memory_space<vmem>>, vector<1x8x32xbf16>
      %17 = vector.shape_cast %16 : vector<1x8x32xbf16> to vector<8x32xbf16>
      %c0_10 = arith.constant 0 : index
      %c0_11 = arith.constant 0 : index
      %18 = vector.load %arg4[%c0_10, %c0_11] : memref<32x16xbf16, #tpu.memory_space<vmem>>, vector<32x16xbf16>
      %cst = arith.constant dense<0.000000e+00> : vector<8x16xf32>
      %19 = tpu.matmul %17, %18, %cst {dimension_numbers = #tpu.dot_dimension_numbers<[1], [0], [0], [1], [0, 0, 1, 1], [], []>} : vector<8x32xbf16>, vector<32x16xbf16>, vector<8x16xf32> -> vector<8x16xf32>
      %c0_12 = arith.constant 0 : index
      %c0_13 = arith.constant 0 : index
      %20 = vector.load %arg5[%c0_12, %c0_13] : memref<1x16xf32, #tpu.memory_space<vmem>>, vector<1x16xf32>
      %21 = vector.broadcast %20 : vector<1x16xf32> to vector<8x16xf32>
      %22 = arith.addf %19, %21 : vector<8x16xf32>
      %cst_14 = arith.constant 0.000000e+00 : f32
      %23 = vector.broadcast %cst_14 : f32 to vector<8x16xf32>
      %24 = arith.maximumf %22, %23 : vector<8x16xf32>
      %25 = arith.truncf %24 : vector<8x16xf32> to vector<8x16xbf16>
      %c0_15 = arith.constant 0 : index
      %c0_16 = arith.constant 0 : index
      %26 = vector.load %arg6[%c0_15, %c0_16] : memref<16x8xbf16, #tpu.memory_space<vmem>>, vector<16x8xbf16>
      %cst_17 = arith.constant dense<0.000000e+00> : vector<8x8xf32>
      %27 = tpu.matmul %25, %26, %cst_17 {dimension_numbers = #tpu.dot_dimension_numbers<[1], [0], [0], [1], [0, 0, 1, 1], [], []>} : vector<8x16xbf16>, vector<16x8xbf16>, vector<8x8xf32> -> vector<8x8xf32>
      %c0_18 = arith.constant 0 : index
      %c0_19 = arith.constant 0 : index
      %28 = vector.load %arg7[%c0_18, %c0_19] : memref<1x8xf32, #tpu.memory_space<vmem>>, vector<1x8xf32>
      %29 = vector.broadcast %28 : vector<1x8xf32> to vector<8x8xf32>
      %30 = arith.addf %27, %29 : vector<8x8xf32>
      %cst_20 = arith.constant 0.000000e+00 : f32
      %31 = vector.broadcast %cst_20 : f32 to vector<8x8xf32>
      %32 = arith.maximumf %30, %31 : vector<8x8xf32>
      %c0_21 = arith.constant 0 : index
      %c0_22 = arith.constant 0 : index
      %33 = vector.load %arg15[%c0_21, %c0_22] : memref<2x8xf32, #tpu.memory_space<vmem>>, vector<2x8xf32>
      %cst_23 = arith.constant dense<0.000000e+00> : vector<8x2xf32>
      %34 = tpu.matmul %32, %33, %cst_23 {dimension_numbers = #tpu.dot_dimension_numbers<[1], [1], [0], [0], [0, 0, 1, 0], [], []>} : vector<8x8xf32>, vector<2x8xf32>, vector<8x2xf32> -> vector<8x2xf32>
      %c0_24 = arith.constant 0 : index
      %c0_25 = arith.constant 0 : index
      %c0_26 = arith.constant 0 : index
      %35 = vector.load %arg13[%c0_24, %c0_25, %c0_26] : memref<1x8x2xf32, #tpu.memory_space<vmem>>, vector<1x8x2xf32>
      %36 = vector.shape_cast %35 : vector<1x8x2xf32> to vector<8x2xf32>
      %37 = vector.shape_cast %34 : vector<8x2xf32> to vector<1x8x2xf32>
      tpu.vector_store %arg13[%c0_24, %c0_25, %c0_26], %37 {strides = array<i32>} : memref<1x8x2xf32, #tpu.memory_space<vmem>>, vector<1x8x2xf32>,
    } else {
    }
    return
  }
  func.func @transform_0(%arg0: i32, %arg1: i32, %arg2: i32) -> (i32, i32, i32) {
    %c0_i32 = arith.constant 0 : i32
    %c0_i32_0 = arith.constant 0 : i32
    return %arg0, %arg2, %c0_i32 : i32, i32, i32
  }
  func.func @transform_1(%arg0: i32, %arg1: i32, %arg2: i32) -> (i32, i32) {
    %c0_i32 = arith.constant 0 : i32
    %c0_i32_0 = arith.constant 0 : i32
    %c0_i32_1 = arith.constant 0 : i32
    return %c0_i32, %c0_i32_0 : i32, i32
  }
  func.func @transform_2(%arg0: i32, %arg1: i32, %arg2: i32) -> (i32, i32) {
    %c0_i32 = arith.constant 0 : i32
    %c0_i32_0 = arith.constant 0 : i32
    %c0_i32_1 = arith.constant 0 : i32
    return %c0_i32, %c0_i32_0 : i32, i32
  }
  func.func @transform_3(%arg0: i32, %arg1: i32, %arg2: i32) -> (i32, i32) {
    %c0_i32 = arith.constant 0 : i32
    %c0_i32_0 = arith.constant 0 : i32
    %c0_i32_1 = arith.constant 0 : i32
    return %c0_i32, %c0_i32_0 : i32, i32
  }
  func.func @transform_4(%arg0: i32, %arg1: i32, %arg2: i32) -> (i32, i32) {
    %c0_i32 = arith.constant 0 : i32
    %c0_i32_0 = arith.constant 0 : i32
    %c0_i32_1 = arith.constant 0 : i32
    return %c0_i32, %c0_i32_0 : i32, i32
  }
  func.func @transform_5(%arg0: i32, %arg1: i32, %arg2: i32) -> (i32, i32) {
    %c0_i32 = arith.constant 0 : i32
    %c0_i32_0 = arith.constant 0 : i32
    %c0_i32_1 = arith.constant 0 : i32
    return %c0_i32, %c0_i32_0 : i32, i32
  }
  func.func @transform_6(%arg0: i32, %arg1: i32, %arg2: i32) -> (i32, i32) {
    %c0_i32 = arith.constant 0 : i32
    %c0_i32_0 = arith.constant 0 : i32
    %c0_i32_1 = arith.constant 0 : i32
    return %c0_i32, %c0_i32_0 : i32, i32
  }
  func.func @transform_7(%arg0: i32, %arg1: i32, %arg2: i32) -> (i32, i32) {
    %c0_i32 = arith.constant 0 : i32
    %c0_i32_0 = arith.constant 0 : i32
    %c0_i32_1 = arith.constant 0 : i32
    return %c0_i32, %c0_i32_0 : i32, i32
  }
  func.func @transform_8(%arg0: i32, %arg1: i32, %arg2: i32) -> (i32, i32) {
    %c0_i32 = arith.constant 0 : i32
    %c0_i32_0 = arith.constant 0 : i32
    %c0_i32_1 = arith.constant 0 : i32
    return %c0_i32, %c0_i32_0 : i32, i32
  }
  func.func @transform_9(%arg0: i32, %arg1: i32, %arg2: i32) -> (i32, i32, i32) {
    %c0_i32 = arith.constant 0 : i32
    %c0_i32_0 = arith.constant 0 : i32
    %c0_i32_1 = arith.constant 0 : i32
    %c0_i32_2 = arith.constant 0 : i32
    return %c0_i32, %c0_i32_0, %c0_i32_1 : i32, i32, i32
  }
  func.func @transform_10(%arg0: i32, %arg1: i32, %arg2: i32) -> (i32, i32, i32) {
    %c0_i32 = arith.constant 0 : i32
    %c0_i32_0 = arith.constant 0 : i32
    return %arg0, %arg2, %c0_i32 : i32, i32, i32
  }
}

</mosaic_0001>

<bundles_post_ra>
// kernel: tpu_custom_call.1
= control target key start
LH: loop header
LB: loop body
LE: loop exit
PB: predicated region body
PF: predicated region fallthrough
CT: control target
= control target key end

     0   :  { %s1256_s13 = smov 0   ;;  %s1258_s14 = smov 0   ;;  %s1359_s0 = inlined_call_operand.vmem [shape: bf16[2,8,32], index: 0, kind: input, shape index: {}]   ;;  %s1360_s1 = inlined_call_operand.vmem [shape: bf16[32,16], index: 1, kind: input, shape index: {}]   ;;  %s1361_s2 = inlined_call_operand.vmem [shape: f32[1,16], index: 2, kind: input, shape index: {}]   ;;  %s1362_s3 = inlined_call_operand.vmem [shape: bf16[16,8], index: 3, kind: input, shape index: {}]   ;;  %s1363_s4 = inlined_call_operand.vmem [shape: f32[1,8], index: 4, kind: input, shape index: {}]   ;;  %s1364_s5 = inlined_call_operand.vmem [shape: bf16[32,16], index: 5, kind: input, shape index: {}]   ;;  %s1365_s6 = inlined_call_operand.vmem [shape: f32[1,16], index: 6, kind: input, shape index: {}]   ;;  %s1366_s7 = inlined_call_operand.vmem [shape: bf16[16,8], index: 7, kind: input, shape index: {}]   ;;  %s1367_s8 = inlined_call_operand.vmem [shape: f32[1,8], index: 8, kind: input, shape index: {}]   ;;  %s1368_s9 = inlined_call_operand.vmem [shape: f32[2,8,8], index: 9, kind: input, shape index: {}]   ;;  %s1369_s10 = inlined_call_operand.vmem [shape: f32[2,8,2], index: 10, kind: output, shape index: {}]  }
   0x1   :  { %s1260_s15 = smov 0   ;;  %s1262_s16 = smov 0  }
   0x2   :  { %s1264_s17 = smov 0  }
   0x3 LB: > { %s35_s18 = sadd.s32 1, %s1184_s15  ;;  %s39_s19 = sadd.s32 1, %s1188_s16  ;;  %s1192_s17 = sphi %s1264_s17, %s20_s17   ;;  %s1188_s16 = sphi %s1262_s16, %s1373_s16   ;;  %s1184_s15 = sphi %s1260_s15, %s1372_s15   ;;  %s1180_s14 = sphi %s1258_s14, %s1371_s14   ;;  %s1176_s13 = sphi %s1256_s13, %s1370_s13  }
   0x4   : > { %p37_p0 = scmp.ge.s32.totalorder %s35_s18, 2  ;;  %p1010_p1 = scmp.ge.s32.totalorder %s1192_s17, 1 }
   0x5   : > { %p337_p2 = scmp.lt.s32.totalorder %s1192_s17, 5 }
   0x6   : > { %s1375_s18 = smov (%p37_p0, %s35_s18), 0  ;;  %s1377_s19 = smov (!%p37_p0, %s39_s19), %s1188_s16 }
   0x7   : > { %p338_p3 = pnand %p1010_p1, %p337_p2  ;;  %p41_p4 = scmp.ge.s32.totalorder %s1377_s19, 2 }
   0x8   : > { %p379_p5 = scmp.lt.s32.totalorder (!%p338_p3), %s1180_s14, 1  ;;  %p394_p6 = scmp.eq.s32.totalorder (!%p338_p3), %s1176_s13, 0 }
   0x9   : > { %s1379_s19 = smov (%p41_p4, %s1377_s19), 0  ;;  %341 = sbr.rel (%p338_p3) target bundleno = 1361 (0x551), region = 60 }
  0x10   : > { %s1381_s14 = smov (!%p379_p5, %s1180_s14), 1  ;;  %399 = sbr.rel (!%p394_p6) target bundleno = 23 (0x17), region = 64 }
  0x11   : > { %s1011_s20 = sshll.u32 %s1381_s14, 2  ;;  %s1012_s21 = sshll.u32 %s1381_s14, 3  ;;  %vm400_vm0 = vcmask (%p394_p6), 57344   ;;  %v1194_v0 = vmov (%p394_p6), 0.0  }
  0x12   : > { %s1292_s24 = scalar_lea.vmem %s1359_s0, %s1011_s20  ;;  %s1297_s27 = scalar_lea.vmem %s1369_s10, %s1012_s21  ;;  %401 = vst.msk [vmem:[#allocation2] sm:$0x1] (%p394_p6), %vm400_vm0, %v1194_v0 }
  0x17 PF: > { %p1014_p7 = scmp.ne.s32.totalorder %s1176_s13, 0 }
  0x18   : > { %v1148_v1 = vld [vmem:[%s1364_s5] sm:$0xff] (!%p1014_p7)   ;;  %v1195_v2 = vmov (!%p1014_p7), 0.0   ;;  %v1149_v3 = vld [vmem:[%s1364_s5 + $0x8] sm:$0xff] (!%p1014_p7)   ;;  %vm1196_vm1 = vmmov (!%p1014_p7), 0   ;;  %vm429_vm2 = vcmask (!%p1014_p7), 261120   ;;  %vm490_vm3 = vcmask (!%p1014_p7), 130048  }
  0x19   : > { %404 = sbr.rel (%p1014_p7) target bundleno = 483 (0x1e3), region = 68  ;;  %1058 = vmatprep.subr.bf16.mxu0 (!%p1014_p7), %v1195_v2  ;;  %1066 = vmatprep.subr.bf16.mxu1 (!%p1014_p7), %v1195_v2  ;;  %v405_v4 = vld [vmem:[%s1292_s24] sm:$0xf] (!%p1014_p7)  ;;  %vm536_vm4 = vcmask (!%p1014_p7), 64512   ;;  %vm545_vm5 = vcmask (!%p1014_p7), 57344  }
  0x1a   : > { %1059 = vmatpush3.bf16.msra.mxu0 (!%p1014_p7), %v1148_v1  ;;  %1062 = vmatprep.mubr.msk.bf16.mxu0 (!%p1014_p7), %vm1196_vm1, %v1195_v2  ;;  %v1150_v5 = vld [vmem:[%s1366_s7] sm:$0xff] (!%p1014_p7)  }
  0x1b   : > { %1060 = vmatprep.subr.bf16.mxu0 (!%p1014_p7), %v1195_v2  ;;  %1068 = vmatprep.mubr.msk.bf16.mxu1 (!%p1014_p7), %vm1196_vm1, %v1195_v2  ;;  %v1015_v6 = vld [vmem:[%s1365_s6] ss:$0 sm:$0xff] (!%p1014_p7) }
  0x1c   : > { %1067 = vmatpush3.bf16.msra.mxu1 (!%p1014_p7), %v1150_v5  ;;  %v1019_v14 = vld [vmem:[%s1367_s8] ss:$0 sm:$0xff] (!%p1014_p7) }
  0x1d   : > { %v535_v27 = vld [vmem:[#allocation2] sm:$0x1] (!%p1014_p7) }
  0x1e   : > { %1061 = vmatpush3.bf16.msra.mxu0 (!%p1014_p7), %v1149_v3 }
  0x21   : > { %1063 = vmatmul.mubr.msk.bf16.vlgmr.msra.gmra.mrb[0].mxu0 %vm429_vm2, %v405_v4 }
  0xf4   : > { %v467_v7 = vpop.f32.mrb[0].mxu0 }
  0xf5   : > { %v468_v8 = vadd.f32 %v1015_v6, %v467_v7  ;;  %v1064_v9 = vpop.f32.mrb[1].mxu0 }
  0xf6   : > { %v470_v10 = vpop.f32.mrb[2].mxu0 }
  0xf7   : > { %v473_v11 = vmax.f32 %v468_v8, 0.0  ;;  %v1065_v12 = vpop.f32.mrb[3].mxu0 }
  0xf9   : > { %v474_v13 = vpack.c.bf16 %v473_v11, %v473_v11 }
  0xfb   : > { %1069 = vmatmul.mubr.msk.bf16.vlgmr.msra.gmra.mrb[0].mxu1 %vm490_vm3, %v474_v13 }
 0x1ce   : > { %v528_v15 = vpop.f32.mrb[0].mxu1 }
 0x1cf   : > { %v529_v16 = vadd.f32 %v1019_v14, %v528_v15  ;;  %v1070_v17 = vpop.f32.mrb[1].mxu1 }
 0x1d0   : > { %v531_v18 = vpop.f32.mrb[2].mxu1 }
 0x1d1   : > { %v534_v19 = vmax.f32 %v529_v16, 0.0  ;;  %v1071_v20 = vpop.f32.mrb[3].mxu1 }
 0x1d3   : > { %v537_v21 = vsel %vm536_vm4, %v534_v19, 0.0 }
 0x1d4   : > { %v538_v22 = vrot.slane %v537_v21, 4 }
 0x1d6   : > { %v539_v23 = vadd.f32 %v538_v22, %v537_v21 }
 0x1d8   : > { %v540_v24 = vrot.slane %v539_v23, 2 }
 0x1da   : > { %v541_v25 = vadd.f32 %v540_v24, %v539_v23 }
 0x1dc   : > { %v542_v26 = vrot.slane %v541_v25, 1 }
 0x1de   : > { %v543_v28 = vadd.f32 %v542_v26, %v541_v25 }
 0x1e0   : > { %v544_v29 = vadd.f32 %v543_v28, %v535_v27 }
 0x1e2   : > { %546 = vst.msk [vmem:[#allocation2] sm:$0x1] %vm545_vm5, %v544_v29 }
 0x1e3 PF: > { %p547_p8 = scmp.eq.s32.totalorder %s1176_s13, 1 }
 0x1e4   : > { %v553_v30 = vld [vmem:[%s1368_s9] sm:$0xff] (%p547_p8)  ;;  %vm554_vm6 = vcmask (%p547_p8), 64512   ;;  %v1025_v31 = vld [vmem:[%s1368_s9 + $0x8] sm:$0xff] (%p547_p8)  ;;  %v1197_v32 = vmov (%p547_p8), 0.0   ;;  %vm1198_vm7 = vmmov (%p547_p8), 0   ;;  %vm631_vm8 = vcmask (%p547_p8), 57344  }
 0x1e5   : > { %551 = sbr.rel (!%p547_p8) target bundleno = 704 (0x2c0), region = 72  ;;  %1072 = vmatprep.subr.mxu0 (%p547_p8), %v1197_v32  ;;  %1077 = vmatprep.subr.mxu1 (%p547_p8), %v1197_v32 }
 0x1e6   : > { %1073 = vmatpush3.xpose.msk.msra.mxu0 (%p547_p8), %vm554_vm6, %v553_v30  ;;  %1078 = vmatpush3.xpose.msk.msra.mxu1 (%p547_p8), %vm554_vm6, %v1025_v31 }
 0x1e7   : > { %1074 = vmatprep.mubr.msk.f32.mxu0 (%p547_p8), %vm1198_vm7, %v1197_v32  ;;  %1079 = vmatprep.mubr.msk.f32.mxu1 (%p547_p8), %vm1198_vm7, %v1197_v32 }
 0x1e9   : > { %v552_v33 = vld [vmem:[#allocation2] sm:$0x1] (%p547_p8) }
 0x1ea   : > { %v633_v34 = vld [vmem:[#allocation2] sm:$0x1] (%p547_p8)  ;;  %1075 = vmatmul.mubr.msk.f32.vlgmr.msra.gmra.mrb[0].mxu0 (%p547_p8), %vm554_vm6, %v552_v33 }
 0x1eb   : > { %1080 = vmatmul.mubr.msk.f32.vlgmr.msra.gmra.mrb[0].mxu1 (%p547_p8), %vm554_vm6, %v633_v34 }
 0x2bd   : > { %v627_v35 = vpop.f32.mrb[0].mxu0 }
 0x2be   : > { %v708_v36 = vpop.f32.mrb[0].mxu1  ;;  %632 = vst.msk [vmem:[#allocation3] sm:$0x1] %vm631_vm8, %v627_v35  ;;  %v1076_v37 = vpop.f32.mrb[1].mxu0 }
 0x2bf   : > { %712 = vst.msk [vmem:[#allocation3 + $0x1] sm:$0x1] %vm631_vm8, %v708_v36  ;;  %v1081_v38 = vpop.f32.mrb[1].mxu1 }
 0x2c0 PF: > { %p1028_p9 = scmp.ne.s32.totalorder %s1176_s13, 1 }
 0x2c1   : > { %v1151_v39 = vld [vmem:[%s1360_s1] sm:$0xff] (!%p1028_p9)   ;;  %v1199_v40 = vmov (!%p1028_p9), 0.0   ;;  %v1152_v41 = vld [vmem:[%s1360_s1 + $0x8] sm:$0xff] (!%p1028_p9)   ;;  %vm1200_vm9 = vmmov (!%p1028_p9), 0   ;;  %vm740_vm10 = vcmask (!%p1028_p9), 261120   ;;  %vm801_vm11 = vcmask (!%p1028_p9), 130048  }
 0x2c2   : > { %715 = sbr.rel (%p1028_p9) target bundleno = 1361 (0x551), region = 76  ;;  %1082 = vmatprep.subr.bf16.mxu0 (!%p1028_p9), %v1199_v40  ;;  %1090 = vmatprep.subr.bf16.mxu1 (!%p1028_p9), %v1199_v40  ;;  %v716_v42 = vld [vmem:[%s1292_s24] sm:$0xf] (!%p1028_p9)  ;;  %vm847_vm12 = vcmask (!%p1028_p9), 64512   ;;  %vm924_vm13 = vcmask (!%p1028_p9), 15360  }
 0x2c3   : > { %1083 = vmatpush3.bf16.msra.mxu0 (!%p1028_p9), %v1151_v39  ;;  %1086 = vmatprep.mubr.msk.bf16.mxu0 (!%p1028_p9), %vm1200_vm9, %v1199_v40  ;;  %v1153_v43 = vld [vmem:[%s1362_s3] sm:$0xff] (!%p1028_p9)  }
 0x2c4   : > { %1084 = vmatprep.subr.bf16.mxu0 (!%p1028_p9), %v1199_v40  ;;  %1092 = vmatprep.mubr.msk.bf16.mxu1 (!%p1028_p9), %vm1200_vm9, %v1199_v40  ;;  %v1029_v44 = vld [vmem:[%s1361_s2] ss:$0 sm:$0xff] (!%p1028_p9) }
 0x2c5   : > { %1091 = vmatpush3.bf16.msra.mxu1 (!%p1028_p9), %v1153_v43  ;;  %v1033_v53 = vld [vmem:[%s1363_s4] ss:$0 sm:$0xff] (!%p1028_p9) }
 0x2c6   : > { %1096 = vmatprep.subr.mxu1 (!%p1028_p9), %v1199_v40  ;;  %v846_v52 = vld [vmem:[#allocation3] sm:$0x3] (!%p1028_p9) }
 0x2c7   : > { %1085 = vmatpush3.bf16.msra.mxu0 (!%p1028_p9), %v1152_v41 }
 0x2ca   : > { %1087 = vmatmul.mubr.msk.bf16.vlgmr.msra.gmra.mrb[0].mxu0 %vm740_vm10, %v716_v42 }
 0x39d   : > { %v778_v45 = vpop.f32.mrb[0].mxu0 }
 0x39e   : > { %v779_v46 = vadd.f32 %v1029_v44, %v778_v45  ;;  %v1088_v47 = vpop.f32.mrb[1].mxu0 }
 0x39f   : > { %v781_v48 = vpop.f32.mrb[2].mxu0 }
 0x3a0   : > { %v784_v49 = vmax.f32 %v779_v46, 0.0  ;;  %v1089_v50 = vpop.f32.mrb[3].mxu0 }
 0x3a2   : > { %v785_v51 = vpack.c.bf16 %v784_v49, %v784_v49 }
 0x3a4   : > { %1093 = vmatmul.mubr.msk.bf16.vlgmr.msra.gmra.mrb[0].mxu1 %vm801_vm11, %v785_v51 }
 0x3a5   : > { %1097 = vmatpush3.xpose.msk.msra.mxu1 %vm847_vm12, %v846_v52  ;;  %1098 = vmatprep.mubr.msk.f32.mxu1 %vm1200_vm9, %v1199_v40 }
 0x477   : > { %v839_v54 = vpop.f32.mrb[0].mxu1 }
 0x478   : > { %v840_v55 = vadd.f32 %v1033_v53, %v839_v54  ;;  %v1094_v56 = vpop.f32.mrb[1].mxu1 }
 0x479   : > { %v842_v57 = vpop.f32.mrb[2].mxu1 }
 0x47a   : > { %v845_v58 = vmax.f32 %v840_v55, 0.0  ;;  %v1095_v59 = vpop.f32.mrb[3].mxu1 }
 0x47c   : > { %1099 = vmatmul.mubr.msk.f32.vlgmr.msra.gmra.mrb[4].mxu1 %vm847_vm12, %v845_v58 }
 0x54f   : > { %v920_v60 = vpop.f32.mrb[4].mxu1 }
 0x550   : > { %925 = vst.msk [vmem:[%s1297_s27] sm:$0xff] %vm924_vm13, %v920_v60  ;;  %v1100_v61 = vpop.f32.mrb[5].mxu1 }
 0x551 PF: > { %s20_s17 = sadd.s32 1, %s1192_s17   ;;  %s1370_s13 = smov %s1184_s15 }
 0x552   : > { %p17_p10 = scmp.ge.s32.totalorder %s20_s17, 6   ;;  %s1371_s14 = smov %s1188_s16 }
 0x553   : > { %s1372_s15 = smov %s1375_s18  ;;  %s1373_s16 = smov %s1379_s19 }
 0x554   :  { %19 = sbr.rel (!%p17_p10) target bundleno = 3 (0x3), region = 107 }

// kernel: tpu_custom_call.1
= control target key start
LH: loop header
LB: loop body
LE: loop exit
PB: predicated region body
PF: predicated region fallthrough
CT: control target
= control target key end

     0   :  { %s1256_s13 = smov 0   ;;  %s1258_s14 = smov 0   ;;  %s1359_s0 = inlined_call_operand.vmem [shape: bf16[2,8,32], index: 0, kind: input, shape index: {}]   ;;  %s1360_s1 = inlined_call_operand.vmem [shape: bf16[32,16], index: 1, kind: input, shape index: {}]   ;;  %s1361_s2 = inlined_call_operand.vmem [shape: f32[1,16], index: 2, kind: input, shape index: {}]   ;;  %s1362_s3 = inlined_call_operand.vmem [shape: bf16[16,8], index: 3, kind: input, shape index: {}]   ;;  %s1363_s4 = inlined_call_operand.vmem [shape: f32[1,8], index: 4, kind: input, shape index: {}]   ;;  %s1364_s5 = inlined_call_operand.vmem [shape: bf16[32,16], index: 5, kind: input, shape index: {}]   ;;  %s1365_s6 = inlined_call_operand.vmem [shape: f32[1,16], index: 6, kind: input, shape index: {}]   ;;  %s1366_s7 = inlined_call_operand.vmem [shape: bf16[16,8], index: 7, kind: input, shape index: {}]   ;;  %s1367_s8 = inlined_call_operand.vmem [shape: f32[1,8], index: 8, kind: input, shape index: {}]   ;;  %s1368_s9 = inlined_call_operand.vmem [shape: f32[2,8,8], index: 9, kind: input, shape index: {}]   ;;  %s1369_s10 = inlined_call_operand.vmem [shape: f32[2,8,2], index: 10, kind: output, shape index: {}]  }
   0x1   :  { %s1260_s15 = smov 0   ;;  %s1262_s16 = smov 0  }
   0x2   :  { %s1264_s17 = smov 0  }
   0x3 LB: > { %s35_s18 = sadd.s32 1, %s1184_s15  ;;  %s39_s19 = sadd.s32 1, %s1188_s16  ;;  %s1192_s17 = sphi %s1264_s17, %s20_s17   ;;  %s1188_s16 = sphi %s1262_s16, %s1373_s16   ;;  %s1184_s15 = sphi %s1260_s15, %s1372_s15   ;;  %s1180_s14 = sphi %s1258_s14, %s1371_s14   ;;  %s1176_s13 = sphi %s1256_s13, %s1370_s13  }
   0x4   : > { %p37_p0 = scmp.ge.s32.totalorder %s35_s18, 2  ;;  %p1010_p1 = scmp.ge.s32.totalorder %s1192_s17, 1 }
   0x5   : > { %p337_p2 = scmp.lt.s32.totalorder %s1192_s17, 5 }
   0x6   : > { %s1375_s18 = smov (%p37_p0, %s35_s18), 0  ;;  %s1377_s19 = smov (!%p37_p0, %s39_s19), %s1188_s16 }
   0x7   : > { %p338_p3 = pnand %p1010_p1, %p337_p2  ;;  %p41_p4 = scmp.ge.s32.totalorder %s1377_s19, 2 }
   0x8   : > { %p379_p5 = scmp.lt.s32.totalorder (!%p338_p3), %s1180_s14, 1  ;;  %p394_p6 = scmp.eq.s32.totalorder (!%p338_p3), %s1176_s13, 0 }
   0x9   : > { %s1379_s19 = smov (%p41_p4, %s1377_s19), 0  ;;  %341 = sbr.rel (%p338_p3) target bundleno = 1361 (0x551), region = 60 }
  0x10   : > { %s1381_s14 = smov (!%p379_p5, %s1180_s14), 1  ;;  %399 = sbr.rel (!%p394_p6) target bundleno = 23 (0x17), region = 64 }
  0x11   : > { %s1011_s20 = sshll.u32 %s1381_s14, 2  ;;  %s1012_s21 = sshll.u32 %s1381_s14, 3  ;;  %vm400_vm0 = vcmask (%p394_p6), 57344   ;;  %v1194_v0 = vmov (%p394_p6), 0.0  }
  0x12   : > { %s1292_s24 = scalar_lea.vmem %s1359_s0, %s1011_s20  ;;  %s1297_s27 = scalar_lea.vmem %s1369_s10, %s1012_s21  ;;  %401 = vst.msk [vmem:[#allocation2] sm:$0x1] (%p394_p6), %vm400_vm0, %v1194_v0 }
  0x17 PF: > { %p1014_p7 = scmp.ne.s32.totalorder %s1176_s13, 0 }
  0x18   : > { %v1148_v1 = vld [vmem:[%s1364_s5] sm:$0xff] (!%p1014_p7)   ;;  %v1195_v2 = vmov (!%p1014_p7), 0.0   ;;  %v1149_v3 = vld [vmem:[%s1364_s5 + $0x8] sm:$0xff] (!%p1014_p7)   ;;  %vm1196_vm1 = vmmov (!%p1014_p7), 0   ;;  %vm429_vm2 = vcmask (!%p1014_p7), 261120   ;;  %vm490_vm3 = vcmask (!%p1014_p7), 130048  }
  0x19   : > { %404 = sbr.rel (%p1014_p7) target bundleno = 483 (0x1e3), region = 68  ;;  %1058 = vmatprep.subr.bf16.mxu0 (!%p1014_p7), %v1195_v2  ;;  %1066 = vmatprep.subr.bf16.mxu1 (!%p1014_p7), %v1195_v2  ;;  %v405_v4 = vld [vmem:[%s1292_s24] sm:$0xf] (!%p1014_p7)  ;;  %vm536_vm4 = vcmask (!%p1014_p7), 64512   ;;  %vm545_vm5 = vcmask (!%p1014_p7), 57344  }
  0x1a   : > { %1059 = vmatpush3.bf16.msra.mxu0 (!%p1014_p7), %v1148_v1  ;;  %1062 = vmatprep.mubr.msk.bf16.mxu0 (!%p1014_p7), %vm1196_vm1, %v1195_v2  ;;  %v1150_v5 = vld [vmem:[%s1366_s7] sm:$0xff] (!%p1014_p7)  }
  0x1b   : > { %1060 = vmatprep.subr.bf16.mxu0 (!%p1014_p7), %v1195_v2  ;;  %1068 = vmatprep.mubr.msk.bf16.mxu1 (!%p1014_p7), %vm1196_vm1, %v1195_v2  ;;  %v1015_v6 = vld [vmem:[%s1365_s6] ss:$0 sm:$0xff] (!%p1014_p7) }
  0x1c   : > { %1067 = vmatpush3.bf16.msra.mxu1 (!%p1014_p7), %v1150_v5  ;;  %v1019_v14 = vld [vmem:[%s1367_s8] ss:$0 sm:$0xff] (!%p1014_p7) }
  0x1d   : > { %v535_v27 = vld [vmem:[#allocation2] sm:$0x1] (!%p1014_p7) }
  0x1e   : > { %1061 = vmatpush3.bf16.msra.mxu0 (!%p1014_p7), %v1149_v3 }
  0x21   : > { %1063 = vmatmul.mubr.msk.bf16.vlgmr.msra.gmra.mrb[0].mxu0 %vm429_vm2, %v405_v4 }
  0xf4   : > { %v467_v7 = vpop.f32.mrb[0].mxu0 }
  0xf5   : > { %v468_v8 = vadd.f32 %v1015_v6, %v467_v7  ;;  %v1064_v9 = vpop.f32.mrb[1].mxu0 }
  0xf6   : > { %v470_v10 = vpop.f32.mrb[2].mxu0 }
  0xf7   : > { %v473_v11 = vmax.f32 %v468_v8, 0.0  ;;  %v1065_v12 = vpop.f32.mrb[3].mxu0 }
  0xf9   : > { %v474_v13 = vpack.c.bf16 %v473_v11, %v473_v11 }
  0xfb   : > { %1069 = vmatmul.mubr.msk.bf16.vlgmr.msra.gmra.mrb[0].mxu1 %vm490_vm3, %v474_v13 }
 0x1ce   : > { %v528_v15 = vpop.f32.mrb[0].mxu1 }
 0x1cf   : > { %v529_v16 = vadd.f32 %v1019_v14, %v528_v15  ;;  %v1070_v17 = vpop.f32.mrb[1].mxu1 }
 0x1d0   : > { %v531_v18 = vpop.f32.mrb[2].mxu1 }
 0x1d1   : > { %v534_v19 = vmax.f32 %v529_v16, 0.0  ;;  %v1071_v20 = vpop.f32.mrb[3].mxu1 }
 0x1d3   : > { %v537_v21 = vsel %vm536_vm4, %v534_v19, 0.0 }
 0x1d4   : > { %v538_v22 = vrot.slane %v537_v21, 4 }
 0x1d6   : > { %v539_v23 = vadd.f32 %v538_v22, %v537_v21 }
 0x1d8   : > { %v540_v24 = vrot.slane %v539_v23, 2 }
 0x1da   : > { %v541_v25 = vadd.f32 %v540_v24, %v539_v23 }
 0x1dc   : > { %v542_v26 = vrot.slane %v541_v25, 1 }
 0x1de   : > { %v543_v28 = vadd.f32 %v542_v26, %v541_v25 }
 0x1e0   : > { %v544_v29 = vadd.f32 %v543_v28, %v535_v27 }
 0x1e2   : > { %546 = vst.msk [vmem:[#allocation2] sm:$0x1] %vm545_vm5, %v544_v29 }
 0x1e3 PF: > { %p547_p8 = scmp.eq.s32.totalorder %s1176_s13, 1 }
 0x1e4   : > { %v553_v30 = vld [vmem:[%s1368_s9] sm:$0xff] (%p547_p8)  ;;  %vm554_vm6 = vcmask (%p547_p8), 64512   ;;  %v1025_v31 = vld [vmem:[%s1368_s9 + $0x8] sm:$0xff] (%p547_p8)  ;;  %v1197_v32 = vmov (%p547_p8), 0.0   ;;  %vm1198_vm7 = vmmov (%p547_p8), 0   ;;  %vm631_vm8 = vcmask (%p547_p8), 57344  }
 0x1e5   : > { %551 = sbr.rel (!%p547_p8) target bundleno = 704 (0x2c0), region = 72  ;;  %1072 = vmatprep.subr.mxu0 (%p547_p8), %v1197_v32  ;;  %1077 = vmatprep.subr.mxu1 (%p547_p8), %v1197_v32 }
 0x1e6   : > { %1073 = vmatpush3.xpose.msk.msra.mxu0 (%p547_p8), %vm554_vm6, %v553_v30  ;;  %1078 = vmatpush3.xpose.msk.msra.mxu1 (%p547_p8), %vm554_vm6, %v1025_v31 }
 0x1e7   : > { %1074 = vmatprep.mubr.msk.f32.mxu0 (%p547_p8), %vm1198_vm7, %v1197_v32  ;;  %1079 = vmatprep.mubr.msk.f32.mxu1 (%p547_p8), %vm1198_vm7, %v1197_v32 }
 0x1e9   : > { %v552_v33 = vld [vmem:[#allocation2] sm:$0x1] (%p547_p8) }
 0x1ea   : > { %v633_v34 = vld [vmem:[#allocation2] sm:$0x1] (%p547_p8)  ;;  %1075 = vmatmul.mubr.msk.f32.vlgmr.msra.gmra.mrb[0].mxu0 (%p547_p8), %vm554_vm6, %v552_v33 }
 0x1eb   : > { %1080 = vmatmul.mubr.msk.f32.vlgmr.msra.gmra.mrb[0].mxu1 (%p547_p8), %vm554_vm6, %v633_v34 }
 0x2bd   : > { %v627_v35 = vpop.f32.mrb[0].mxu0 }
 0x2be   : > { %v708_v36 = vpop.f32.mrb[0].mxu1  ;;  %632 = vst.msk [vmem:[#allocation3] sm:$0x1] %vm631_vm8, %v627_v35  ;;  %v1076_v37 = vpop.f32.mrb[1].mxu0 }
 0x2bf   : > { %712 = vst.msk [vmem:[#allocation3 + $0x1] sm:$0x1] %vm631_vm8, %v708_v36  ;;  %v1081_v38 = vpop.f32.mrb[1].mxu1 }
 0x2c0 PF: > { %p1028_p9 = scmp.ne.s32.totalorder %s1176_s13, 1 }
 0x2c1   : > { %v1151_v39 = vld [vmem:[%s1360_s1] sm:$0xff] (!%p1028_p9)   ;;  %v1199_v40 = vmov (!%p1028_p9), 0.0   ;;  %v1152_v41 = vld [vmem:[%s1360_s1 + $0x8] sm:$0xff] (!%p1028_p9)   ;;  %vm1200_vm9 = vmmov (!%p1028_p9), 0   ;;  %vm740_vm10 = vcmask (!%p1028_p9), 261120   ;;  %vm801_vm11 = vcmask (!%p1028_p9), 130048  }
 0x2c2   : > { %715 = sbr.rel (%p1028_p9) target bundleno = 1361 (0x551), region = 76  ;;  %1082 = vmatprep.subr.bf16.mxu0 (!%p1028_p9), %v1199_v40  ;;  %1090 = vmatprep.subr.bf16.mxu1 (!%p1028_p9), %v1199_v40  ;;  %v716_v42 = vld [vmem:[%s1292_s24] sm:$0xf] (!%p1028_p9)  ;;  %vm847_vm12 = vcmask (!%p1028_p9), 64512   ;;  %vm924_vm13 = vcmask (!%p1028_p9), 15360  }
 0x2c3   : > { %1083 = vmatpush3.bf16.msra.mxu0 (!%p1028_p9), %v1151_v39  ;;  %1086 = vmatprep.mubr.msk.bf16.mxu0 (!%p1028_p9), %vm1200_vm9, %v1199_v40  ;;  %v1153_v43 = vld [vmem:[%s1362_s3] sm:$0xff] (!%p1028_p9)  }
 0x2c4   : > { %1084 = vmatprep.subr.bf16.mxu0 (!%p1028_p9), %v1199_v40  ;;  %1092 = vmatprep.mubr.msk.bf16.mxu1 (!%p1028_p9), %vm1200_vm9, %v1199_v40  ;;  %v1029_v44 = vld [vmem:[%s1361_s2] ss:$0 sm:$0xff] (!%p1028_p9) }
 0x2c5   : > { %1091 = vmatpush3.bf16.msra.mxu1 (!%p1028_p9), %v1153_v43  ;;  %v1033_v53 = vld [vmem:[%s1363_s4] ss:$0 sm:$0xff] (!%p1028_p9) }
 0x2c6   : > { %1096 = vmatprep.subr.mxu1 (!%p1028_p9), %v1199_v40  ;;  %v846_v52 = vld [vmem:[#allocation3] sm:$0x3] (!%p1028_p9) }
 0x2c7   : > { %1085 = vmatpush3.bf16.msra.mxu0 (!%p1028_p9), %v1152_v41 }
 0x2ca   : > { %1087 = vmatmul.mubr.msk.bf16.vlgmr.msra.gmra.mrb[0].mxu0 %vm740_vm10, %v716_v42 }
 0x39d   : > { %v778_v45 = vpop.f32.mrb[0].mxu0 }
 0x39e   : > { %v779_v46 = vadd.f32 %v1029_v44, %v778_v45  ;;  %v1088_v47 = vpop.f32.mrb[1].mxu0 }
 0x39f   : > { %v781_v48 = vpop.f32.mrb[2].mxu0 }
 0x3a0   : > { %v784_v49 = vmax.f32 %v779_v46, 0.0  ;;  %v1089_v50 = vpop.f32.mrb[3].mxu0 }
 0x3a2   : > { %v785_v51 = vpack.c.bf16 %v784_v49, %v784_v49 }
 0x3a4   : > { %1093 = vmatmul.mubr.msk.bf16.vlgmr.msra.gmra.mrb[0].mxu1 %vm801_vm11, %v785_v51 }
 0x3a5   : > { %1097 = vmatpush3.xpose.msk.msra.mxu1 %vm847_vm12, %v846_v52  ;;  %1098 = vmatprep.mubr.msk.f32.mxu1 %vm1200_vm9, %v1199_v40 }
 0x477   : > { %v839_v54 = vpop.f32.mrb[0].mxu1 }
 0x478   : > { %v840_v55 = vadd.f32 %v1033_v53, %v839_v54  ;;  %v1094_v56 = vpop.f32.mrb[1].mxu1 }
 0x479   : > { %v842_v57 = vpop.f32.mrb[2].mxu1 }
 0x47a   : > { %v845_v58 = vmax.f32 %v840_v55, 0.0  ;;  %v1095_v59 = vpop.f32.mrb[3].mxu1 }
 0x47c   : > { %1099 = vmatmul.mubr.msk.f32.vlgmr.msra.gmra.mrb[4].mxu1 %vm847_vm12, %v845_v58 }
 0x54f   : > { %v920_v60 = vpop.f32.mrb[4].mxu1 }
 0x550   : > { %925 = vst.msk [vmem:[%s1297_s27] sm:$0xff] %vm924_vm13, %v920_v60  ;;  %v1100_v61 = vpop.f32.mrb[5].mxu1 }
 0x551 PF: > { %s20_s17 = sadd.s32 1, %s1192_s17   ;;  %s1370_s13 = smov %s1184_s15 }
 0x552   : > { %p17_p10 = scmp.ge.s32.totalorder %s20_s17, 6   ;;  %s1371_s14 = smov %s1188_s16 }
 0x553   : > { %s1372_s15 = smov %s1375_s18  ;;  %s1373_s16 = smov %s1379_s19 }
 0x554   :  { %19 = sbr.rel (!%p17_p10) target bundleno = 3 (0x3), region = 107 }

</bundles_post_ra>
